<compile_context>
chip_gen: v7x
topology: tpu7x:2x2x1
jax: 0.10.0
libtpu: 0.0.40
codegen_flags: <defaults>
</compile_context>

<pallas_src>
import functools

import jax
import jax.numpy as jnp
from jax.experimental import pallas as pl
from jax.experimental.pallas import tpu as pltpu


def cond_embedding_kernel(x_ref, wm_ref, wl_ref, bm_ref, bl_ref, eps_ref,
                          c_ref, mean_ref, logsigma_ref):
    x = x_ref[...]

    # mean half: (TM, noise) @ (noise, emb) + (1, emb)   — MXU, f32 accumulate
    mean = jnp.dot(x, wm_ref[...], preferred_element_type=jnp.float32)
    mean = mean + bm_ref[...]
    mean = jnp.maximum(mean, 0.2 * mean)          # LeakyReLU(0.2)

    # logsigma half: independent matmul, written straight to its output ref
    logsigma = jnp.dot(x, wl_ref[...], preferred_element_type=jnp.float32)
    logsigma = logsigma + bl_ref[...]
    logsigma = jnp.maximum(logsigma, 0.2 * logsigma)

    # Reparameterized sample: c = eps * exp(logsigma) + mean   (all f32)
    c = eps_ref[...] * jnp.exp(logsigma) + mean

    mean_ref[...] = mean.astype(mean_ref.dtype)
    logsigma_ref[...] = logsigma.astype(logsigma_ref.dtype)
    c_ref[...] = c.astype(c_ref.dtype)


def prepare_params(weight, bias, *, matmul_dtype=None):
    """One-time (init-time) parameter repack: split PyTorch-layout weight
    (2*emb, noise) / bias (2*emb,) into per-half, matmul-ready tensors.

    Returns (w_mu, w_ls, b_mu, b_ls):
      w_mu, w_ls : (noise, emb)   — already transposed for x @ W
      b_mu, b_ls : (1, emb)       — one lane tile each
    """
    two_emb, _ = weight.shape
    emb = two_emb // 2
    w_t = weight.T                               # (noise, 2*emb) — done ONCE
    w_mu, w_ls = w_t[:, :emb], w_t[:, emb:]
    b_mu = bias[:emb].reshape(1, emb)
    b_ls = bias[emb:].reshape(1, emb)
    if matmul_dtype is not None:
        w_mu = w_mu.astype(matmul_dtype)
        w_ls = w_ls.astype(matmul_dtype)
    return w_mu, w_ls, b_mu, b_ls


@functools.partial(jax.jit, static_argnames=("block_b", "matmul_dtype"))
def cond_embedding(inputs, w_mu, w_ls, b_mu, b_ls, epsilon,
                   *, block_b=256, matmul_dtype=None):
    """inputs: (B, noise); w_mu/w_ls: (noise, emb); b_mu/b_ls: (1, emb);
    epsilon: (B, emb). Returns (c, mean, logsigma), each (B, emb) f32."""
    B, noise_dim = inputs.shape
    emb_dim = w_mu.shape[1]

    if matmul_dtype is not None:
        # bf16 matmul inputs (v6e/v7x fast path); accumulation + elementwise
        # math stay f32 inside the kernel.
        inputs = inputs.astype(matmul_dtype)
        w_mu = w_mu.astype(matmul_dtype)
        w_ls = w_ls.astype(matmul_dtype)

    tm = min(block_b, B)
    grid = (pl.cdiv(B, tm),)

    out_shapes = (
        jax.ShapeDtypeStruct((B, emb_dim), jnp.float32),   # c
        jax.ShapeDtypeStruct((B, emb_dim), jnp.float32),   # mean
        jax.ShapeDtypeStruct((B, emb_dim), jnp.float32),   # logsigma
    )

    batch_spec = lambda cols: pl.BlockSpec((tm, cols), lambda i: (i, 0))
    const_spec = lambda rows, cols: pl.BlockSpec((rows, cols), lambda i: (0, 0))

    itemsize = jnp.dtype(inputs.dtype).itemsize
    cost = pl.CostEstimate(
        flops=2 * B * noise_dim * 2 * emb_dim,
        transcendentals=B * emb_dim,                       # exp(logsigma)
        bytes_accessed=(B * noise_dim * itemsize            # x
                        + 2 * noise_dim * emb_dim * itemsize  # W halves
                        + 2 * emb_dim * 4                     # bias halves
                        + B * emb_dim * 4                     # eps
                        + 3 * B * emb_dim * 4),               # 3 outputs
    )

    return pl.pallas_call(
        cond_embedding_kernel,
        out_shape=out_shapes,
        grid=grid,
        in_specs=[
            batch_spec(noise_dim),            # x        (tm, noise)
            const_spec(noise_dim, emb_dim),   # w_mu     (noise, emb), resident
            const_spec(noise_dim, emb_dim),   # w_ls     (noise, emb), resident
            const_spec(1, emb_dim),           # b_mu     (1, emb)
            const_spec(1, emb_dim),           # b_ls     (1, emb)
            batch_spec(emb_dim),              # epsilon  (tm, emb)
        ],
        out_specs=(
            batch_spec(emb_dim),              # c
            batch_spec(emb_dim),              # mean
            batch_spec(emb_dim),              # logsigma
        ),
        compiler_params=pltpu.CompilerParams(
            dimension_semantics=("parallel",)),   # megacore-shardable on v7x
        cost_estimate=cost,
    )(inputs, w_mu, w_ls, b_mu, b_ls, epsilon)


def _reference(inputs, weight, bias, epsilon, emb_dim):
    out = inputs @ weight.T + bias
    out = jnp.where(out > 0, out, 0.2 * out)
    mean, logsigma = out[:, :emb_dim], out[:, emb_dim:]
    c = epsilon * jnp.exp(logsigma) + mean
    return c, mean, logsigma


if __name__ == "__main__":
    # Small shapes consistent with the module: noise_dim=32, emb_dim=128.
    noise_dim, emb_dim = 32, 128

    key = jax.random.PRNGKey(0)
    k_x, k_w, k_b, k_eps, k_x2, k_eps2 = jax.random.split(key, 6)

    # nn.Linear default init: U[-1/sqrt(fan_in), 1/sqrt(fan_in)].
    bound = 1.0 / (noise_dim ** 0.5)
    weight = jax.random.uniform(k_w, (2 * emb_dim, noise_dim),
                                minval=-bound, maxval=bound, dtype=jnp.float32)
    bias = jax.random.uniform(k_b, (2 * emb_dim,),
                              minval=-bound, maxval=bound, dtype=jnp.float32)

    # One-time repack (would live at module init in a real model).
    w_mu, w_ls, b_mu, b_ls = prepare_params(weight, bias)

    # --- Case 1: tiny batch (single grid step), f32 ---
    B = 8
    inputs = jax.random.normal(k_x, (B, noise_dim), dtype=jnp.float32)
    # TODO(synk): epsilon (torch .normal_() inside forward) is generated host-side.
    epsilon = jax.random.normal(k_eps, (B, emb_dim), dtype=jnp.float32)

    c, mean, logsigma = cond_embedding(inputs, w_mu, w_ls, b_mu, b_ls, epsilon)
    jax.block_until_ready((c, mean, logsigma))

    rc, rm, rl = _reference(inputs, weight, bias, epsilon, emb_dim)
    assert jnp.allclose(mean, rm, atol=1e-5), "mean mismatch (B=8)"
    assert jnp.allclose(logsigma, rl, atol=1e-5), "logsigma mismatch (B=8)"
    assert jnp.allclose(c, rc, atol=1e-5), "c mismatch (B=8)"

    # --- Case 2: batched path exercising the grid (2 steps of 128 rows) ---
    B2 = 256
    inputs2 = jax.random.normal(k_x2, (B2, noise_dim), dtype=jnp.float32)
    epsilon2 = jax.random.normal(k_eps2, (B2, emb_dim), dtype=jnp.float32)

    c2, m2, l2 = cond_embedding(inputs2, w_mu, w_ls, b_mu, b_ls, epsilon2,
                                block_b=128)
    jax.block_until_ready((c2, m2, l2))

    rc2, rm2, rl2 = _reference(inputs2, weight, bias, epsilon2, emb_dim)
    assert jnp.allclose(m2, rm2, atol=1e-5), "mean mismatch (B=256)"
    assert jnp.allclose(l2, rl2, atol=1e-5), "logsigma mismatch (B=256)"
    assert jnp.allclose(c2, rc2, atol=1e-5), "c mismatch (B=256)"

    # --- Case 3: bf16 matmul-input fast path (v6e/v7x) — smoke test only ---
    c3, m3, l3 = cond_embedding(inputs2, w_mu, w_ls, b_mu, b_ls, epsilon2,
                                block_b=128, matmul_dtype=jnp.bfloat16)
    jax.block_until_ready((c3, m3, l3))

    print("KERNEL_OK")
</pallas_src>

<mosaic_0001>
module attributes {stable_mosaic.version = 11 : i64} {
  func.func @cond_embedding_kernel(%arg0: i32, %arg1: memref<8x32xf32, #tpu.memory_space<vmem>>, %arg2: memref<32x128xf32, #tpu.memory_space<vmem>>, %arg3: memref<32x128xf32, #tpu.memory_space<vmem>>, %arg4: memref<1x128xf32, #tpu.memory_space<vmem>>, %arg5: memref<1x128xf32, #tpu.memory_space<vmem>>, %arg6: memref<8x128xf32, #tpu.memory_space<vmem>>, %arg7: memref<8x128xf32, #tpu.memory_space<vmem>>, %arg8: memref<8x128xf32, #tpu.memory_space<vmem>>, %arg9: memref<8x128xf32, #tpu.memory_space<vmem>>) attributes {dimension_semantics = [#tpu.dimension_semantics<parallel>], iteration_bounds = array<i64: 1>, scalar_prefetch = 0 : i64, scratch_operands = 0 : i64, tpu.core_type = #tpu.core_type<tc>, window_params = [{transform_indices = @transform_0, window_bounds = array<i64: 8, 32>}, {pipeline_mode = #tpu.pipeline_mode<synchronous>, transform_indices = @transform_1, window_bounds = array<i64: 32, 128>}, {pipeline_mode = #tpu.pipeline_mode<synchronous>, transform_indices = @transform_2, window_bounds = array<i64: 32, 128>}, {pipeline_mode = #tpu.pipeline_mode<synchronous>, transform_indices = @transform_3, window_bounds = array<i64: 1, 128>}, {pipeline_mode = #tpu.pipeline_mode<synchronous>, transform_indices = @transform_4, window_bounds = array<i64: 1, 128>}, {transform_indices = @transform_5, window_bounds = array<i64: 8, 128>}, {transform_indices = @transform_6, window_bounds = array<i64: 8, 128>}, {transform_indices = @transform_7, window_bounds = array<i64: 8, 128>}, {transform_indices = @transform_8, window_bounds = array<i64: 8, 128>}]} {
    %c0 = arith.constant 0 : index
    %c0_0 = arith.constant 0 : index
    %0 = vector.load %arg1[%c0, %c0_0] : memref<8x32xf32, #tpu.memory_space<vmem>>, vector<8x32xf32>
    %c0_1 = arith.constant 0 : index
    %c0_2 = arith.constant 0 : index
    %1 = vector.load %arg2[%c0_1, %c0_2] : memref<32x128xf32, #tpu.memory_space<vmem>>, vector<32x128xf32>
    %cst = arith.constant dense<0.000000e+00> : vector<8x128xf32>
    %2 = tpu.matmul %0, %1, %cst {dimension_numbers = #tpu.dot_dimension_numbers<[1], [0], [0], [1], [0, 0, 1, 1], [], []>} : vector<8x32xf32>, vector<32x128xf32>, vector<8x128xf32> -> vector<8x128xf32>
    %c0_3 = arith.constant 0 : index
    %c0_4 = arith.constant 0 : index
    %3 = vector.load %arg4[%c0_3, %c0_4] : memref<1x128xf32, #tpu.memory_space<vmem>>, vector<1x128xf32>
    %4 = vector.broadcast %3 : vector<1x128xf32> to vector<8x128xf32>
    %5 = arith.addf %2, %4 : vector<8x128xf32>
    %cst_5 = arith.constant 2.000000e-01 : f32
    %6 = vector.broadcast %cst_5 : f32 to vector<8x128xf32>
    %7 = arith.mulf %6, %5 : vector<8x128xf32>
    %8 = arith.maximumf %5, %7 : vector<8x128xf32>
    %c0_6 = arith.constant 0 : index
    %c0_7 = arith.constant 0 : index
    %9 = vector.load %arg3[%c0_6, %c0_7] : memref<32x128xf32, #tpu.memory_space<vmem>>, vector<32x128xf32>
    %cst_8 = arith.constant dense<0.000000e+00> : vector<8x128xf32>
    %10 = tpu.matmul %0, %9, %cst_8 {dimension_numbers = #tpu.dot_dimension_numbers<[1], [0], [0], [1], [0, 0, 1, 1], [], []>} : vector<8x32xf32>, vector<32x128xf32>, vector<8x128xf32> -> vector<8x128xf32>
    %c0_9 = arith.constant 0 : index
    %c0_10 = arith.constant 0 : index
    %11 = vector.load %arg5[%c0_9, %c0_10] : memref<1x128xf32, #tpu.memory_space<vmem>>, vector<1x128xf32>
    %12 = vector.broadcast %11 : vector<1x128xf32> to vector<8x128xf32>
    %13 = arith.addf %10, %12 : vector<8x128xf32>
    %cst_11 = arith.constant 2.000000e-01 : f32
    %14 = vector.broadcast %cst_11 : f32 to vector<8x128xf32>
    %15 = arith.mulf %14, %13 : vector<8x128xf32>
    %16 = arith.maximumf %13, %15 : vector<8x128xf32>
    %c0_12 = arith.constant 0 : index
    %c0_13 = arith.constant 0 : index
    %17 = vector.load %arg6[%c0_12, %c0_13] : memref<8x128xf32, #tpu.memory_space<vmem>>, vector<8x128xf32>
    %18 = math.exp %16 : vector<8x128xf32>
    %19 = arith.mulf %17, %18 : vector<8x128xf32>
    %20 = arith.addf %19, %8 : vector<8x128xf32>
    %c0_14 = arith.constant 0 : index
    %c0_15 = arith.constant 0 : index
    %21 = vector.load %arg8[%c0_14, %c0_15] : memref<8x128xf32, #tpu.memory_space<vmem>>, vector<8x128xf32>
    tpu.vector_store %arg8[%c0_14, %c0_15], %8 {strides = array<i32>} : memref<8x128xf32, #tpu.memory_space<vmem>>, vector<8x128xf32>,
    %c0_16 = arith.constant 0 : index
    %c0_17 = arith.constant 0 : index
    %22 = vector.load %arg9[%c0_16, %c0_17] : memref<8x128xf32, #tpu.memory_space<vmem>>, vector<8x128xf32>
    tpu.vector_store %arg9[%c0_16, %c0_17], %16 {strides = array<i32>} : memref<8x128xf32, #tpu.memory_space<vmem>>, vector<8x128xf32>,
    %c0_18 = arith.constant 0 : index
    %c0_19 = arith.constant 0 : index
    %23 = vector.load %arg7[%c0_18, %c0_19] : memref<8x128xf32, #tpu.memory_space<vmem>>, vector<8x128xf32>
    tpu.vector_store %arg7[%c0_18, %c0_19], %20 {strides = array<i32>} : memref<8x128xf32, #tpu.memory_space<vmem>>, vector<8x128xf32>,
    return
  }
  func.func @transform_0(%arg0: i32) -> (i32, i32) {
    %c0_i32 = arith.constant 0 : i32
    %c0_i32_0 = arith.constant 0 : i32
    return %arg0, %c0_i32 : i32, i32
  }
  func.func @transform_1(%arg0: i32) -> (i32, i32) {
    %c0_i32 = arith.constant 0 : i32
    %c0_i32_0 = arith.constant 0 : i32
    %c0_i32_1 = arith.constant 0 : i32
    return %c0_i32, %c0_i32_0 : i32, i32
  }
  func.func @transform_2(%arg0: i32) -> (i32, i32) {
    %c0_i32 = arith.constant 0 : i32
    %c0_i32_0 = arith.constant 0 : i32
    %c0_i32_1 = arith.constant 0 : i32
    return %c0_i32, %c0_i32_0 : i32, i32
  }
  func.func @transform_3(%arg0: i32) -> (i32, i32) {
    %c0_i32 = arith.constant 0 : i32
    %c0_i32_0 = arith.constant 0 : i32
    %c0_i32_1 = arith.constant 0 : i32
    return %c0_i32, %c0_i32_0 : i32, i32
  }
  func.func @transform_4(%arg0: i32) -> (i32, i32) {
    %c0_i32 = arith.constant 0 : i32
    %c0_i32_0 = arith.constant 0 : i32
    %c0_i32_1 = arith.constant 0 : i32
    return %c0_i32, %c0_i32_0 : i32, i32
  }
  func.func @transform_5(%arg0: i32) -> (i32, i32) {
    %c0_i32 = arith.constant 0 : i32
    %c0_i32_0 = arith.constant 0 : i32
    return %arg0, %c0_i32 : i32, i32
  }
  func.func @transform_6(%arg0: i32) -> (i32, i32) {
    %c0_i32 = arith.constant 0 : i32
    %c0_i32_0 = arith.constant 0 : i32
    return %arg0, %c0_i32 : i32, i32
  }
  func.func @transform_7(%arg0: i32) -> (i32, i32) {
    %c0_i32 = arith.constant 0 : i32
    %c0_i32_0 = arith.constant 0 : i32
    return %arg0, %c0_i32 : i32, i32
  }
  func.func @transform_8(%arg0: i32) -> (i32, i32) {
    %c0_i32 = arith.constant 0 : i32
    %c0_i32_0 = arith.constant 0 : i32
    return %arg0, %c0_i32 : i32, i32
  }
}

</mosaic_0001>

<bundles_post_ra>
// kernel: cond_embedding.1
= control target key start
LH: loop header
LB: loop body
LE: loop exit
PB: predicated region body
PF: predicated region fallthrough
CT: control target
= control target key end

     0   :  { %14 = vsyncpa [#allocation3], 0  ;;  %s633_s0 = inlined_call_operand.hbm [shape: f32[8,32], index: 0, kind: input, shape index: {}]   ;;  %s634_s1 = inlined_call_operand.hbm [shape: f32[32,128], index: 1, kind: input, shape index: {}]   ;;  %s635_s2 = inlined_call_operand.hbm [shape: f32[32,128], index: 2, kind: input, shape index: {}]   ;;  %s636_s3 = inlined_call_operand.vmem [shape: f32[1,128], index: 3, kind: input, shape index: {}]   ;;  %s637_s4 = inlined_call_operand.vmem [shape: f32[1,128], index: 4, kind: input, shape index: {}]   ;;  %s638_s5 = inlined_call_operand.vmem [shape: f32[8,128], index: 5, kind: input, shape index: {}]   ;;  %s639_s6 = inlined_call_operand.hbm [shape: f32[8,128], index: 6, kind: output, shape index: {0}]   ;;  %s640_s7 = inlined_call_operand.hbm [shape: f32[8,128], index: 7, kind: output, shape index: {1}]   ;;  %s641_s8 = inlined_call_operand.hbm [shape: f32[8,128], index: 8, kind: output, shape index: {2}]  }
   0x1   :  { %15 = vsyncpa [#allocation6], 0 }
   0x2   :  { %16 = vsyncpa [#allocation4], 0 }
   0x3   :  { %17 = vsyncpa [#allocation10], 0  ;;  %s490_s27 = smov [#allocation5]   ;;  %s350_s9 = scalar_lea.hbm %s634_s1, 512 }
   0x4   :  { %s33_s28 = sshll.u32 %s490_s27, 4  ;;  %p351_p0 = scmp.ne.s32.totalorder %s634_s1, %s350_s9  ;;  %s34_s28 = int_to_ptr.vmem [resolvable:$true] %s33_s28 }
   0x5   :  { %p354_p1 = scmp.lt.u32.totalorder %s350_s9, %s634_s1 }
   0x7   :  { %p356_p2 = pnand %p354_p1, %p351_p0 }
   0x9   :  { %359 = shalt.err (!%p356_p2)
}
   0xa   :  { %s360_s14 = scalar_lea.vmem %s34_s28, 512  ;;  %p365_p4 = scmp.lt.s32.totalorder %s34_s28, %s34_s28 }
   0xb   :  { %p361_p3 = scmp.ne.s32.totalorder %s34_s28, %s360_s14  ;;  %p366_p5 = scmp.lt.s32.totalorder %s360_s14, %s360_s14 }
   0xd   :  { %p367_p6 = por %p366_p5, %p365_p4 }
   0xf   :  { %p368_p7 = pnand %p367_p6, %p361_p3 }
  0x11   :  { %371 = shalt.err (!%p368_p7)
}
  0x12   :  { %s491_s15 = smov 128   ;;  %s492_s16 = smov 8  }
  0x13   :  { %39 = dma.hbm_to_vmem [thread:$0]  %s634_s1, 512, %s34_s28, [#allocation6], %s491_s15, %s491_s15, %s492_s16  }
  0x14   :  { %s493_s19 = smov [#allocation2]   ;;  %s494_s21 = smov [#allocation7]  }
  0x15   :  { %s24_s20 = sshll.u32 %s493_s19, 4  ;;  %s45_s22 = sshll.u32 %s494_s21, 4  ;;  %s25_s20 = int_to_ptr.vmem [resolvable:$true] %s24_s20  ;;  %s46_s22 = int_to_ptr.vmem [resolvable:$true] %s45_s22 }
  0x16   :  { %s372_s25 = scalar_lea.hbm %s633_s0, 128 }
  0x17   :  { %p373_p8 = scmp.ne.s32.totalorder %s633_s0, %s372_s25  ;;  %p376_p9 = scmp.lt.u32.totalorder %s372_s25, %s633_s0 }
  0x19   :  { %p378_p10 = pnand %p376_p9, %p373_p8 }
  0x1b   :  { %381 = shalt.err (!%p378_p10)
}
  0x1c   :  { %s382_s1 = scalar_lea.vmem %s25_s20, 128  ;;  %p387_p12 = scmp.lt.s32.totalorder %s25_s20, %s25_s20 }
  0x1d   :  { %p383_p11 = scmp.ne.s32.totalorder %s25_s20, %s382_s1  ;;  %p388_p13 = scmp.lt.s32.totalorder %s382_s1, %s382_s1 }
  0x1f   :  { %p389_p0 = por %p388_p13, %p387_p12 }
  0x21   :  { %p390_p1 = pnand %p389_p0, %p383_p11 }
  0x23   :  { %393 = shalt.err (!%p390_p1)
}
  0x24   :  { %27 = dma.hbm_to_vmem [thread:$0]  %s633_s0, 128, %s25_s20, [#allocation3]  }
  0x25   :  { %s394_s12 = scalar_lea.hbm %s635_s2, 512 }
  0x26   :  { %p395_p2 = scmp.ne.s32.totalorder %s635_s2, %s394_s12  ;;  %p398_p3 = scmp.lt.u32.totalorder %s394_s12, %s635_s2 }
  0x28   :  { %p400_p4 = pnand %p398_p3, %p395_p2 }
  0x2a   :  { %403 = shalt.err (!%p400_p4)
}
  0x2b   :  { %s404_s19 = scalar_lea.vmem %s46_s22, 512  ;;  %p409_p6 = scmp.lt.s32.totalorder %s46_s22, %s46_s22 }
  0x2c   :  { %p405_p5 = scmp.ne.s32.totalorder %s46_s22, %s404_s19  ;;  %p410_p7 = scmp.lt.s32.totalorder %s404_s19, %s404_s19 }
  0x2e   :  { %p411_p8 = por %p410_p7, %p409_p6 }
  0x30   :  { %p412_p9 = pnand %p411_p8, %p405_p5 }
  0x32   :  { %415 = shalt.err (!%p412_p9)
}
  0x33   :  { %51 = dma.hbm_to_vmem [thread:$0]  %s635_s2, 512, %s46_s22, [#allocation6], %s491_s15, %s491_s15, %s492_s16  }
  0x34   :  { %482 = dma.done.wait [#allocation3], 128  }
  0x35   :  { %483 = vsyncadd [#allocation3], 4294967168 }
  0x36   :  { %484 = dma.done.wait [#allocation6], 1024  }
  0x37   :  { %485 = vsyncadd [#allocation6], 4294966272  ;;  %v495_v0 = vmov 0.0|0.0   ;;  %vm496_vm0 = vmmov 0   ;;  %v497_v1 = vmov 0.0   ;;  %v155_v2 = vld [vmem:[#allocation7] sm:$0xff] }
  0x38   :  { %331 = vmatprep.subr.bf16.mxu1 %v495_v0  ;;  %322 = vmatprep.mubr.msk.f32.mxu1 %vm496_vm0, %v497_v1  ;;  %v156_v3 = vld [vmem:[#allocation7 + $0x8] sm:$0xff]  ;;  %v157_v4 = vld [vmem:[#allocation7 + $0x10] sm:$0xff]  ;;  %v158_v6 = vld [vmem:[#allocation7 + $0x18] sm:$0xff]  ;;  %vm79_vm1 = vcmask 261120   ;;  %s498_s22 = smov [#allocation9]   ;;  %s499_s24 = smov [#allocation11]  }
  0x39   :  { %325 = vmatprep.subr.bf16.mxu0 %v495_v0  ;;  %311 = vmatprep.mubr.msk.f32.mxu0 %vm496_vm0, %v497_v1  ;;  %v332_v5 = vpack.c.bf16 %v156_v3, %v155_v2  ;;  %v68_v7 = vld [vmem:[#allocation5] sm:$0xff]  ;;  %v69_v8 = vld [vmem:[#allocation5 + $0x8] sm:$0xff]  ;;  %v70_v9 = vld [vmem:[#allocation5 + $0x10] sm:$0xff]  ;;  %v335_v11 = vpack.c.bf16 %v158_v6, %v157_v4  ;;  %s262_s23 = sshll.u32 %s498_s22, 4  ;;  %s272_s25 = sshll.u32 %s499_s24, 4  ;;  %s263_s23 = int_to_ptr.vmem [resolvable:$true] %s262_s23  ;;  %s273_s25 = int_to_ptr.vmem [resolvable:$true] %s272_s25 }
  0x3a   :  { %v71_v10 = vld [vmem:[#allocation5 + $0x18] sm:$0xff]  ;;  %v326_v12 = vpack.c.bf16 %v69_v8, %v68_v7  ;;  %p421_p11 = scmp.lt.s32.totalorder %s263_s23, %s263_s23 }
  0x3b   :  { %333 = vmatpush3.bf16.msra.mxu1 %v332_v5  ;;  %v329_v13 = vpack.c.bf16 %v71_v10, %v70_v9  ;;  %v67_v14 = vld [vmem:[#allocation2] sm:$0xff] }
  0x3c   :  { %334 = vmatprep.subr.bf16.mxu1 %v495_v0  ;;  %327 = vmatpush3.bf16.msra.mxu0 %v326_v12  ;;  %v291_v15 = vld [vmem:[%s637_s4] ss:$0 sm:$0xff] }
  0x3d   :  { %328 = vmatprep.subr.bf16.mxu0 %v495_v0  ;;  %v289_v17 = vld [vmem:[%s636_s3] ss:$0 sm:$0xff]  ;;  %s416_s3 = scalar_lea.vmem %s263_s23, 128 }
  0x3e   :  { %p417_p10 = scmp.ne.s32.totalorder %s263_s23, %s416_s3  ;;  %p422_p12 = scmp.lt.s32.totalorder %s416_s3, %s416_s3 }
  0x3f   :  { %336 = vmatpush3.bf16.msra.mxu1 %v335_v11 }
  0x40   :  { %330 = vmatpush3.bf16.msra.mxu0 %v329_v13  ;;  %p423_p13 = por %p422_p12, %p421_p11 }
  0x42   :  { %323 = vmatmul.mubr.msk.f32.vlgmr.msra.gmra.mrb[0].mxu1 %vm79_vm1, %v67_v14  ;;  %p424_p0 = pnand %p423_p13, %p417_p10 }
  0x43   :  { %312 = vmatmul.mubr.msk.f32.vlgmr.msra.gmra.mrb[0].mxu0 %vm79_vm1, %v67_v14 }
 0x115   :  { %v232_v16 = vpop.f32.mrb[0].mxu1 }
 0x116   :  { %v233_v18 = vadd.f32 %v291_v15, %v232_v16  ;;  %v324_v19 = vpop.f32.mrb[1].mxu1  ;;  %v149_v20 = vpop.f32.mrb[0].mxu0 }
 0x117   :  { %v150_v22 = vadd.f32 %v289_v17, %v149_v20  ;;  %v313_v23 = vpop.f32.mrb[1].mxu0 }
 0x118   :  { %v236_v21 = vmul.f32 0.2, %v233_v18 }
 0x119   :  { %v153_v25 = vmul.f32 0.2, %v150_v22 }
 0x11a   :  { %v237_v24 = vmax.f32 %v233_v18, %v236_v21 }
 0x11b   :  { %v154_v27 = vmax.f32 %v150_v22, %v153_v25 }
 0x11c   :  { %v239_v26 = vmul.f32 1.442695, %v237_v24  ;;  %244 = vst [vmem:[#allocation11] sm:$0xff] %v237_v24 }
 0x11d   :  { %243 = vst [vmem:[#allocation9] sm:$0xff] %v154_v27 }
 0x11e   :  { %348 = vpow2.f32 %v239_v26 }
 0x11f   :  { %427 = shalt.err (!%p424_p0)
}
 0x120   :  { %s428_s27 = scalar_lea.hbm %s640_s7, 128 }
 0x121   :  { %p429_p1 = scmp.ne.s32.totalorder %s640_s7, %s428_s27  ;;  %p432_p2 = scmp.lt.u32.totalorder %s428_s27, %s640_s7 }
 0x123   :  { %p434_p3 = pnand %p432_p2, %p429_p1 }
 0x125   :  { %437 = shalt.err (!%p434_p3)
}
 0x126   :  { %265 = dma.vmem_to_hbm [thread:$0]  %s263_s23, 128, %s640_s7, [#allocation10]  }
 0x127   :  { %s438_s11 = scalar_lea.vmem %s273_s25, 128  ;;  %p443_p5 = scmp.lt.s32.totalorder %s273_s25, %s273_s25 }
 0x128   :  { %p439_p4 = scmp.ne.s32.totalorder %s273_s25, %s438_s11  ;;  %p444_p6 = scmp.lt.s32.totalorder %s438_s11, %s438_s11 }
 0x12a   :  { %p445_p7 = por %p444_p6, %p443_p5 }
 0x12c   :  { %p446_p8 = pnand %p445_p7, %p439_p4 }
 0x12e   :  { %449 = shalt.err (!%p446_p8)
}
 0x12f   :  { %s450_s14 = scalar_lea.hbm %s641_s8, 128 }
 0x130   :  { %p451_p9 = scmp.ne.s32.totalorder %s641_s8, %s450_s14  ;;  %p454_p10 = scmp.lt.u32.totalorder %s450_s14, %s641_s8 }
 0x132   :  { %p456_p11 = pnand %p454_p10, %p451_p9 }
 0x134   :  { %459 = shalt.err (!%p456_p11)
}
 0x135   :  { %275 = dma.vmem_to_hbm [thread:$0]  %s273_s25, 128, %s641_s8, [#allocation10]   ;;  %v238_v28 = vld [vmem:[%s638_s5] sm:$0xff]  ;;  %v349_v29 = vpop.eup %348 }
 0x136   :  { %s500_s16 = smov [#allocation8]   ;;  %v241_v30 = vmul.f32 %v349_v29, %v238_v28 }
 0x137   :  { %s252_s21 = sshll.u32 %s500_s16, 4  ;;  %s253_s21 = int_to_ptr.vmem [resolvable:$true] %s252_s21 }
 0x138   :  { %v242_v31 = vadd.f32 %v241_v30, %v154_v27  ;;  %s460_s22 = scalar_lea.vmem %s253_s21, 128  ;;  %p465_p13 = scmp.lt.s32.totalorder %s253_s21, %s253_s21 }
 0x139   :  { %p461_p12 = scmp.ne.s32.totalorder %s253_s21, %s460_s22  ;;  %p466_p0 = scmp.lt.s32.totalorder %s460_s22, %s460_s22 }
 0x13a   :  { %245 = vst [vmem:[#allocation8] sm:$0xff] %v242_v31 }
 0x13b   :  { %p467_p1 = por %p466_p0, %p465_p13 }
 0x13d   :  { %p468_p2 = pnand %p467_p1, %p461_p12 }
 0x13f   :  { %471 = shalt.err (!%p468_p2)
}
 0x140   :  { %s472_s24 = scalar_lea.hbm %s639_s6, 128 }
 0x141   :  { %p473_p3 = scmp.ne.s32.totalorder %s639_s6, %s472_s24  ;;  %p476_p4 = scmp.lt.u32.totalorder %s472_s24, %s639_s6 }
 0x143   :  { %p478_p5 = pnand %p476_p4, %p473_p3 }
 0x145   :  { %481 = shalt.err (!%p478_p5)
}
 0x146   :  { %255 = dma.vmem_to_hbm [thread:$0]  %s253_s21, 128, %s639_s6, [#allocation4]  }
 0x147   :  { %486 = dma.done.wait [#allocation4], 128  }
 0x148   :  { %487 = vsyncadd [#allocation4], 4294967168 }
 0x149   :  { %488 = dma.done.wait [#allocation10], 256  }
 0x14a   :  { %489 = vsyncadd [#allocation10], 4294967040 }
 0x14b   :  { %285 = vsyncpa [#allocation3], 1 }
 0x14c   :  { %286 = vsyncpa [#allocation6], 1 }
 0x14d   :  { %287 = vsyncpa [#allocation4], 1 }
 0x14e   :  { %288 = vsyncpa [#allocation10], 1 }

</bundles_post_ra>
